<compile_context>
chip_gen: v5e
topology: v5e:2x2
jax: 0.10.0
libtpu: 0.0.40
codegen_flags: <defaults>
</compile_context>

<pallas_src>
import functools

import jax
import jax.numpy as jnp
from jax.experimental import pallas as pl
from jax.experimental.pallas import tpu as pltpu


def _round_up(x, m):
    return ((x + m - 1) // m) * m


def _vmem_capacity_bytes():
    # Generation-aware VMEM capacity (v5e/v6e: 128 MiB, v7x: 64 MiB per TC).
    try:
        cap = getattr(pltpu.get_tpu_info(), "vmem_capacity_bytes", None)
        if cap:
            return int(cap)
    except Exception:
        pass
    return 64 * 1024 * 1024          # conservative (v7x) fallback


def _ce_kernel(x_ref, t_ref, w_ref, o_ref, *, epsilon, num_classes, batch,
               block_rows):
    # x_ref: (TB, C) logits tile in its NATIVE dtype (bf16 is not upcast for
    # the mask/select pass); t_ref: (TB, 1) int32 labels; w_ref: (TB, 1) f32
    # per-sample weights; o_ref: (TB, 1) f32 weighted per-sample loss.
    x = x_ref[...]                                                   # (TB, C)

    # Row-validity mask: the last grid step may map past the true batch
    # (logits are NOT padded in the wrapper). Garbage tail rows only feed
    # row-local reductions; their (possibly NaN/inf) losses are selected away
    # below, so they cannot poison the mean.
    row = (pl.program_id(0) * block_rows
           + jax.lax.broadcasted_iota(jnp.int32, (block_rows, 1), 0))
    valid = row < batch                                              # (TB, 1)

    # (1, C) class iota broadcast against the (TB, 1) labels — no (TB, C)
    # iota materialized per grid step.
    cls = jax.lax.broadcasted_iota(jnp.int32, (1, num_classes), 1)
    onehot = cls == t_ref[...]                                       # (TB, C)
    # NOTE: labels outside [0, C) (e.g. ignore_index) never match; the module
    # spec has no ignore_index so that case is not handled here.

    # Pass 1 (native dtype): row max and masked target pick. Both are exact
    # in bf16 (max / one-hot-masked sum of exactly representable values), so
    # only the tiny (TB, 1) results are cast to f32.
    m = jnp.max(x, axis=1, keepdims=True).astype(jnp.float32)        # (TB, 1)
    x_t = jnp.sum(jnp.where(onehot, x, jnp.zeros((), x.dtype)),
                  axis=1, keepdims=True).astype(jnp.float32)         # (TB, 1)

    # Pass 2 (f32): one shifted tile feeds both row reductions; no log_probs,
    # one-hot or smoothed-target temporaries are materialized.
    z = x.astype(jnp.float32) - m                                    # (TB, C)
    sum_z = jnp.sum(z, axis=1, keepdims=True)                        # (TB, 1)
    lse = jnp.log(jnp.sum(jnp.exp(z), axis=1, keepdims=True))        # (TB, 1)

    # loss_b = (1-eps)*(lse - z_t) + (eps/C)*(C*lse - sum_c z_{b,c})
    z_t = x_t - m
    loss = ((1.0 - epsilon) * (lse - z_t)
            + (epsilon / num_classes) * (num_classes * lse - sum_z))

    # Select (not multiply) the tail rows to exactly 0 so NaN*0 cannot occur.
    o_ref[...] = jnp.where(valid, loss * w_ref[...], 0.0)


def cross_entropy_label_smoothing(inputs, targets, weight, *, num_classes,
                                  epsilon=0.1, reduction=True,
                                  block_rows=None):
    """inputs: (B, C) float logits (f32 or bf16); targets: (B,) int; weight: (B,)."""
    B, C = inputs.shape
    assert C == num_classes

    itemsize = jnp.dtype(inputs.dtype).itemsize
    sub = 16 if itemsize == 2 else 8              # sublane packing granularity

    vmem_cap = _vmem_capacity_bytes()
    vmem_limit = max(32 * 1024 * 1024,
                     min((vmem_cap * 3) // 4, 96 * 1024 * 1024))

    if block_rows is None:
        # Size the row tile from a byte budget that counts the double-buffered
        # native-dtype pipeline buffers AND the in-kernel f32 temporaries
        # (z + exp(z)), so big tiles cannot spill — important on v7x (64 MiB).
        # No artificial row cap: multi-MiB tiles are what reach the HBM roofline.
        budget = vmem_limit // 2
        bytes_per_row = C * (4 * itemsize + 8)
        block_rows = max(sub, budget // max(bytes_per_row, 1))

    tb = min(block_rows, _round_up(B, sub))
    # Keep >= 2 grid steps whenever the batch allows it so v7x's two
    # TensorCores both get work (harmless extra ~0.35 us on 1-TC parts).
    if B >= 2 * sub:
        tb = min(tb, _round_up((B + 1) // 2, sub))
    tb = max(sub, (tb // sub) * sub)

    num_tiles = -(-B // tb)                       # ceil(B / tb)

    # No padding of any operand: labels/weights are only reshaped to 2-D so
    # they tile as (tb, 1) blocks; the kernel's row mask handles the tail.
    t2 = targets.astype(jnp.int32).reshape(B, 1)
    w2 = weight.astype(jnp.float32).reshape(B, 1)

    kernel = functools.partial(_ce_kernel, epsilon=float(epsilon),
                               num_classes=int(num_classes), batch=int(B),
                               block_rows=int(tb))

    out = pl.pallas_call(
        kernel,
        out_shape=jax.ShapeDtypeStruct((B, 1), jnp.float32),
        grid_spec=pltpu.PrefetchScalarGridSpec(
            num_scalar_prefetch=0,
            grid=(num_tiles,),
            in_specs=[
                pl.BlockSpec((tb, C), lambda i: (i, 0)),   # logits (native dtype)
                pl.BlockSpec((tb, 1), lambda i: (i, 0)),   # labels
                pl.BlockSpec((tb, 1), lambda i: (i, 0)),   # weights
            ],
            out_specs=pl.BlockSpec((tb, 1), lambda i: (i, 0)),
        ),
        compiler_params=pltpu.CompilerParams(
            dimension_semantics=("parallel",),             # megacore on v7x
            vmem_limit_bytes=int(vmem_limit),
        ),
    )(inputs, t2, w2)

    per_sample = out[:, 0]
    if reduction:
        return jnp.mean(per_sample)                # mean over the true batch
    return per_sample


def _reference(inputs, targets, weight, *, num_classes, epsilon=0.1,
               reduction=True):
    log_probs = jax.nn.log_softmax(inputs.astype(jnp.float32), axis=1)
    t = jax.nn.one_hot(targets, num_classes, dtype=jnp.float32)
    t = (1.0 - epsilon) * t + epsilon / num_classes
    loss = jnp.sum(-t * log_probs, axis=1) * weight.astype(jnp.float32)
    return jnp.mean(loss) if reduction else loss


if __name__ == "__main__":
    key = jax.random.PRNGKey(0)
    ks = jax.random.split(key, 9)

    # Case 1: f32 logits, single tile, mean reduction (toy module shape).
    B1, C1 = 8, 16
    x1 = jax.random.normal(ks[0], (B1, C1), dtype=jnp.float32)
    t1 = jax.random.randint(ks[1], (B1,), 0, C1, dtype=jnp.int32)
    w1 = jax.random.uniform(ks[2], (B1,), dtype=jnp.float32)
    got1 = jax.block_until_ready(cross_entropy_label_smoothing(
        x1, t1, w1, num_classes=C1, epsilon=0.1, reduction=True))
    ref1 = _reference(x1, t1, w1, num_classes=C1, epsilon=0.1, reduction=True)
    assert jnp.allclose(got1, ref1, atol=1e-4, rtol=1e-5), (got1, ref1)

    # Case 2: f32 logits, multi-tile grid with a masked tail block (B % tb != 0,
    # no padding of the logits), per-sample output.
    B2, C2 = 37, 24
    x2 = jax.random.normal(ks[3], (B2, C2), dtype=jnp.float32)
    t2 = jax.random.randint(ks[4], (B2,), 0, C2, dtype=jnp.int32)
    w2 = jax.random.uniform(ks[5], (B2,), dtype=jnp.float32)
    got2 = jax.block_until_ready(cross_entropy_label_smoothing(
        x2, t2, w2, num_classes=C2, epsilon=0.1, reduction=False,
        block_rows=8))
    ref2 = _reference(x2, t2, w2, num_classes=C2, epsilon=0.1, reduction=False)
    assert got2.shape == (B2,)
    assert jnp.allclose(got2, ref2, atol=1e-4, rtol=1e-5), (got2, ref2)

    # Case 3: bf16 logits kept bf16 over HBM and through the mask/select pass;
    # only the shifted tile is f32 inside the kernel.
    B3, C3 = 16, 128
    x3 = jax.random.normal(ks[6], (B3, C3), dtype=jnp.bfloat16)
    t3 = jax.random.randint(ks[7], (B3,), 0, C3, dtype=jnp.int32)
    w3 = jax.random.uniform(ks[8], (B3,), dtype=jnp.float32)
    got3 = jax.block_until_ready(cross_entropy_label_smoothing(
        x3, t3, w3, num_classes=C3, epsilon=0.1, reduction=True))
    ref3 = _reference(x3, t3, w3, num_classes=C3, epsilon=0.1, reduction=True)
    assert jnp.allclose(got3, ref3, atol=1e-4, rtol=1e-4), (got3, ref3)

    print("KERNEL_OK")
</pallas_src>

<mosaic_0001>
module attributes {stable_mosaic.version = 11 : i64} {
  func.func @_ce_kernel(%arg0: i32, %arg1: memref<8x16xf32, #tpu.memory_space<vmem>>, %arg2: memref<8x1xi32, #tpu.memory_space<vmem>>, %arg3: memref<8x1xf32, #tpu.memory_space<vmem>>, %arg4: memref<8x1xf32, #tpu.memory_space<vmem>>) attributes {dimension_semantics = [#tpu.dimension_semantics<parallel>], iteration_bounds = array<i64: 1>, scalar_prefetch = 0 : i64, scratch_operands = 0 : i64, tpu.core_type = #tpu.core_type<tc>, window_params = [{transform_indices = @transform_0, window_bounds = array<i64: 8, 16>}, {transform_indices = @transform_1, window_bounds = array<i64: 8, 1>}, {transform_indices = @transform_2, window_bounds = array<i64: 8, 1>}, {transform_indices = @transform_3, window_bounds = array<i64: 8, 1>}]} {
    %c0 = arith.constant 0 : index
    %c0_0 = arith.constant 0 : index
    %0 = vector.load %arg1[%c0, %c0_0] : memref<8x16xf32, #tpu.memory_space<vmem>>, vector<8x16xf32>
    %c8_i32 = arith.constant 8 : i32
    %1 = arith.muli %arg0, %c8_i32 : i32
    %2 = tpu.iota {dimensions = array<i32: 0>} : vector<8x1xi32>
    %3 = vector.broadcast %1 : i32 to vector<8x1xi32>
    %4 = arith.addi %3, %2 : vector<8x1xi32>
    %c8_i32_1 = arith.constant 8 : i32
    %5 = vector.broadcast %c8_i32_1 : i32 to vector<8x1xi32>
    %6 = arith.cmpi slt, %4, %5 : vector<8x1xi32>
    %7 = tpu.iota {dimensions = array<i32: 1>} : vector<1x16xi32>
    %c0_2 = arith.constant 0 : index
    %c0_3 = arith.constant 0 : index
    %8 = vector.load %arg2[%c0_2, %c0_3] : memref<8x1xi32, #tpu.memory_space<vmem>>, vector<8x1xi32>
    %9 = vector.broadcast %7 : vector<1x16xi32> to vector<8x16xi32>
    %10 = vector.broadcast %8 : vector<8x1xi32> to vector<8x16xi32>
    %11 = arith.cmpi eq, %9, %10 : vector<8x16xi32>
    %cst = arith.constant dense<0xFF800000> : vector<8xf32>
    %12 = vector.multi_reduction <maximumf>, %0, %cst [1] : vector<8x16xf32> to vector<8xf32>
    %13 = vector.shape_cast %12 : vector<8xf32> to vector<8x1xf32>
    %cst_4 = arith.constant 0.000000e+00 : f32
    %14 = vector.broadcast %cst_4 : f32 to vector<8x16xf32>
    %15 = arith.select %11, %0, %14 : vector<8x16xi1>, vector<8x16xf32>
    %cst_5 = arith.constant dense<0.000000e+00> : vector<8xf32>
    %16 = vector.multi_reduction <add>, %15, %cst_5 [1] : vector<8x16xf32> to vector<8xf32>
    %17 = vector.shape_cast %16 : vector<8xf32> to vector<8x1xf32>
    %18 = vector.broadcast %13 : vector<8x1xf32> to vector<8x16xf32>
    %19 = arith.subf %0, %18 : vector<8x16xf32>
    %cst_6 = arith.constant dense<0.000000e+00> : vector<8xf32>
    %20 = vector.multi_reduction <add>, %19, %cst_6 [1] : vector<8x16xf32> to vector<8xf32>
    %21 = vector.shape_cast %20 : vector<8xf32> to vector<8x1xf32>
    %22 = math.exp %19 : vector<8x16xf32>
    %cst_7 = arith.constant dense<0.000000e+00> : vector<8xf32>
    %23 = vector.multi_reduction <add>, %22, %cst_7 [1] : vector<8x16xf32> to vector<8xf32>
    %24 = vector.shape_cast %23 : vector<8xf32> to vector<8x1xf32>
    %25 = math.log %24 : vector<8x1xf32>
    %26 = arith.subf %17, %13 : vector<8x1xf32>
    %27 = arith.subf %25, %26 : vector<8x1xf32>
    %cst_8 = arith.constant 0.899999976 : f32
    %28 = vector.broadcast %cst_8 : f32 to vector<8x1xf32>
    %29 = arith.mulf %28, %27 : vector<8x1xf32>
    %cst_9 = arith.constant 1.600000e+01 : f32
    %30 = vector.broadcast %cst_9 : f32 to vector<8x1xf32>
    %31 = arith.mulf %30, %25 : vector<8x1xf32>
    %32 = arith.subf %31, %21 : vector<8x1xf32>
    %cst_10 = arith.constant 6.250000e-03 : f32
    %33 = vector.broadcast %cst_10 : f32 to vector<8x1xf32>
    %34 = arith.mulf %33, %32 : vector<8x1xf32>
    %35 = arith.addf %29, %34 : vector<8x1xf32>
    %c0_11 = arith.constant 0 : index
    %c0_12 = arith.constant 0 : index
    %36 = vector.load %arg3[%c0_11, %c0_12] : memref<8x1xf32, #tpu.memory_space<vmem>>, vector<8x1xf32>
    %37 = arith.mulf %35, %36 : vector<8x1xf32>
    %cst_13 = arith.constant 0.000000e+00 : f32
    %38 = vector.broadcast %cst_13 : f32 to vector<8x1xf32>
    %39 = arith.select %6, %37, %38 : vector<8x1xi1>, vector<8x1xf32>
    %c0_14 = arith.constant 0 : index
    %c0_15 = arith.constant 0 : index
    %40 = vector.load %arg4[%c0_14, %c0_15] : memref<8x1xf32, #tpu.memory_space<vmem>>, vector<8x1xf32>
    tpu.vector_store %arg4[%c0_14, %c0_15], %39 {strides = array<i32>} : memref<8x1xf32, #tpu.memory_space<vmem>>, vector<8x1xf32>,
    return
  }
  func.func @transform_0(%arg0: i32) -> (i32, i32) {
    %c0_i32 = arith.constant 0 : i32
    %c0_i32_0 = arith.constant 0 : i32
    return %arg0, %c0_i32 : i32, i32
  }
  func.func @transform_1(%arg0: i32) -> (i32, i32) {
    %c0_i32 = arith.constant 0 : i32
    %c0_i32_0 = arith.constant 0 : i32
    return %arg0, %c0_i32 : i32, i32
  }
  func.func @transform_2(%arg0: i32) -> (i32, i32) {
    %c0_i32 = arith.constant 0 : i32
    %c0_i32_0 = arith.constant 0 : i32
    return %arg0, %c0_i32 : i32, i32
  }
  func.func @transform_3(%arg0: i32) -> (i32, i32) {
    %c0_i32 = arith.constant 0 : i32
    %c0_i32_0 = arith.constant 0 : i32
    return %arg0, %c0_i32 : i32, i32
  }
}

</mosaic_0001>

<bundles_post_ra>
// kernel: tpu_custom_call.1
= control target key start
LH: loop header
LB: loop body
LE: loop exit
PB: predicated region body
PF: predicated region fallthrough
CT: control target
= control target key end

     0   :  { %vm28_vm0 = vcmask 130048   ;;  %v69_v1 = vmov 0   ;;  %v21_v10 = vlaneseq  ;;  %vm57_vm2 = vcmask 7168   ;;  %s106_s0 = inlined_call_operand.vmem [shape: f32[8,16], index: 0, kind: input, shape index: {}]   ;;  %s107_s1 = inlined_call_operand.vmem [shape: s32[8,1], index: 1, kind: input, shape index: {}]   ;;  %s108_s2 = inlined_call_operand.vmem [shape: f32[8,1], index: 2, kind: input, shape index: {}]   ;;  %s109_s3 = inlined_call_operand.vmem [shape: f32[8,1], index: 3, kind: output, shape index: {}]  }
   0x1   :  { %v14_v0 = vld [vmem:[%s106_s0] sm:$0xff]  ;;  %64 = vset.pattern.permute.xlu0 %v69_v1 }
   0x2   :  { %v29_v2 = vsel %vm28_vm0, %v14_v0, -inf  ;;  %v23_v3 = vld [vmem:[%s107_s1] sm:$0xff]  ;;  %v22_v11 = vand.u32 127, %v21_v10 }
   0x3   :  { %30 = vmax.xlane.f32.xlu0 %v29_v2  ;;  %v54_v26 = vld [vmem:[%s108_s2] sm:$0xff] }
  0x17   :  { %25 = vperm.xlu0 %64, %v23_v3  }
  0x76   :  { %v31_v4 = vpop.xlane.xlu0 %30 }
  0x77   :  { %v36_v5 = vsub.f32 %v14_v0, %v31_v4 }
  0x79   :  { %v37_v6 = vsel %vm28_vm0, %v36_v5, 0.0  ;;  %v40_v7 = vmul.f32 1.442695, %v36_v5 }
  0x7a   :  { %38 = vadd.xlane.f32.xlu2 %v37_v6 }
  0x7b   :  { %65 = vpow2.f32 %v40_v7 }
  0x81   :  { %v66_v8 = vpop.eup %65 }
  0x82   :  { %v42_v9 = vsel %vm28_vm0, %v66_v8, 0.0 }
  0x83   :  { %43 = vadd.xlane.f32.xlu1 %v42_v9 }
  0x89   :  { %v26_v12 = vpop.permute.xlu0 %25 }
  0x8a   :  { %vm27_vm1 = vcmp.eq.s32.totalorder %v22_v11, %v26_v12 }
  0x8b   :  { %v32_v13 = vsel %vm27_vm1, %v14_v0, 0.0 }
  0x8c   :  { %v33_v14 = vsel %vm28_vm0, %v32_v13, 0.0 }
  0x8d   :  { %34 = vadd.xlane.f32.xlu1 %v33_v14 }
  0xed   :  { %v39_v20 = vpop.xlane.xlu2 %38 }
  0xf6   :  { %v44_v15 = vpop.xlane.xlu1 %43 }
  0xf7   :  { %67 = vlog2.f32 %v44_v15 }
  0xfd   :  { %v68_v16 = vpop.eup %67 }
  0xfe   :  { %v46_v17 = vmul.f32 0.6931472, %v68_v16 }
 0x100   :  { %v50_v18 = vmul.f32 16.0, %v46_v17  ;;  %v35_v19 = vpop.xlane.xlu1 %34 }
 0x101   :  { %v47_v21 = vsub.f32 %v35_v19, %v31_v4 }
 0x102   :  { %v51_v22 = vsub.f32 %v50_v18, %v39_v20 }
 0x103   :  { %v48_v23 = vsub.f32 %v46_v17, %v47_v21 }
 0x104   :  { %v52_v24 = vmul.f32 0.00625, %v51_v22 }
 0x105   :  { %v49_v25 = vmul.f32 0.9, %v48_v23 }
 0x107   :  { %v53_v27 = vadd.f32 %v52_v24, %v49_v25 }
 0x109   :  { %v55_v28 = vmul.f32 %v54_v26, %v53_v27 }
 0x10b   :  { %58 = vst.msk [vmem:[%s109_s3] sm:$0xff] %vm57_vm2, %v55_v28 }

</bundles_post_ra>
